<compile_context>
chip_gen: v6e
topology: v6e:2x2x1
jax: 0.10.0
libtpu: 0.0.40
codegen_flags: <defaults>
</compile_context>

<pallas_src>
import jax
import jax.numpy as jnp
from jax.experimental import pallas as pl
from jax.experimental.pallas import tpu as pltpu


def _round_up(x, m):
    return ((x + m - 1) // m) * m


def bias_tuning_linear_kernel(x_ref, w_ref, aux_ref, o_ref, acc_ref):
    """x_ref: (tm, tk); w_ref: (tk, tn) [pre-transposed (K, N) layout];
    aux_ref: (2, tn) f32 with row 0 = bias+beta, row 1 = alpha;
    o_ref: (tm, tn); acc_ref: f32 (tm, tn) scratch accumulator."""
    k = pl.program_id(2)

    @pl.when(k == 0)
    def _init():
        acc_ref[...] = jnp.zeros_like(acc_ref)

    acc_ref[...] += jnp.dot(
        x_ref[...], w_ref[...], preferred_element_type=jnp.float32
    )

    @pl.when(k == pl.num_programs(2) - 1)
    def _epilogue():
        bpb = aux_ref[0:1, :]     # (1, tn) bias + beta
        alp = aux_ref[1:2, :]     # (1, tn) alpha
        o_ref[...] = (alp * (acc_ref[...] + bpb)).astype(o_ref.dtype)


def bias_tuning_linear(x2d, weight, bias, beta, alpha, *,
                       tm=512, tn=512, tk=512, compute_dtype=None):
    """x2d: (M, K); weight: torch (out, in) = (N, K); bias/beta/alpha: (N,).

    compute_dtype: optional MXU input dtype (e.g. jnp.bfloat16). Accumulation and
    the epilogue stay f32; the output keeps x2d's dtype.
    """
    M, K = x2d.shape
    N, Kw = weight.shape
    assert K == Kw, "weight in_features mismatch"

    out_dtype = x2d.dtype
    mxu_dtype = jnp.dtype(compute_dtype) if compute_dtype is not None else jnp.dtype(x2d.dtype)

    # Dtype-aware minimum sublane tile: f32 -> 8, bf16 -> 16, int8/fp8 -> 32.
    sub_min = {4: 8, 2: 16, 1: 32}.get(mxu_dtype.itemsize, 8)

    # Clamp tiles for small problems (sublane dims multiple of sub_min, lane dims of 128).
    tm = max(min(tm, _round_up(M, sub_min)), sub_min)
    tn = min(tn, _round_up(N, 128))
    tk = min(tk, _round_up(K, 128))

    Mp, Np, Kp = _round_up(M, tm), _round_up(N, tn), _round_up(K, tk)

    # v7x has 2 TensorCores sharding the parallel (i, j) axes; avoid a degenerate
    # 1x1 parallel grid for wide-N shapes by splitting the N axis.
    if (Mp // tm) * (Np // tn) < 2 and Np >= 512 and (Np // 2) % 128 == 0:
        tn = Np // 2

    grid = (Mp // tm, Np // tn, Kp // tk)

    # One-time (K, N) re-layout of W -> plain (tm,tk)x(tk,tn) MXU matmul, no per-tile
    # transpose. Amortized over the Mp/tm times W is re-streamed from HBM.
    w_t = weight.T  # (K, N)

    # Pad only when actually required (typical transformer K/N never pad).
    xp = x2d if (Mp, Kp) == (M, K) else jnp.pad(x2d, ((0, Mp - M), (0, Kp - K)))
    wp = w_t if (Kp, Np) == (K, N) else jnp.pad(w_t, ((0, Kp - K), (0, Np - N)))
    if mxu_dtype != xp.dtype:
        xp = xp.astype(mxu_dtype)
    if mxu_dtype != wp.dtype:
        wp = wp.astype(mxu_dtype)

    # Fuse the two per-output-feature vectors into one (2, Np) f32 aux array.
    bpb = bias.astype(jnp.float32) + beta.astype(jnp.float32)
    aux = jnp.stack([bpb, alpha.astype(jnp.float32)], axis=0)  # (2, N)
    if Np != N:
        aux = jnp.pad(aux, ((0, 0), (0, Np - N)))

    in_itemsize = mxu_dtype.itemsize
    out_itemsize = jnp.dtype(out_dtype).itemsize

    # Double-buffered x/W/aux input tiles + double-buffered output tile + f32 accumulator.
    vmem_needed = (
        2 * (tm * tk + tk * tn) * in_itemsize
        + 2 * 2 * tn * 4
        + 2 * tm * tn * out_itemsize
        + tm * tn * 4
    )
    # Generation-aware scoped-VMEM cap: ~75% of physical (v7x: 64 MiB/TC -> 48 MiB cap;
    # v5e/v6e: 128 MiB -> 96 MiB cap). Floor of 32 MiB so big tiles clear v5e's
    # 16 MiB default scoped limit.
    try:
        vmem_cap = int(pltpu.get_tpu_info().vmem_capacity_bytes)
    except Exception:
        vmem_cap = 64 * 1024 * 1024
    vmem_limit = int(min(max(2 * vmem_needed, 32 * 1024 * 1024), int(0.75 * vmem_cap)))
    vmem_limit = max(vmem_limit, vmem_needed + (4 << 20))

    # Actual HBM traffic of this schedule: X re-read once per j tile, W once per i tile.
    cost = pl.CostEstimate(
        flops=2 * M * N * K,
        bytes_accessed=(
            Mp * Kp * in_itemsize * (Np // tn)
            + Kp * Np * in_itemsize * (Mp // tm)
            + Mp * Np * out_itemsize
            + 2 * Np * 4
        ),
        transcendentals=0,
    )

    # TODO(synk): for decode-like memory-bound shapes (single i tile), sweep
    # pipeline_mode=pl.Buffered(3) on the x/W specs to hide DMA issue latency.
    out_padded = pl.pallas_call(
        bias_tuning_linear_kernel,
        out_shape=jax.ShapeDtypeStruct((Mp, Np), out_dtype),
        grid_spec=pltpu.PrefetchScalarGridSpec(
            num_scalar_prefetch=0,
            grid=grid,
            in_specs=[
                pl.BlockSpec((tm, tk), lambda i, j, k: (i, k)),   # x
                pl.BlockSpec((tk, tn), lambda i, j, k: (k, j)),   # W^T (K, N)
                pl.BlockSpec((2, tn), lambda i, j, k: (0, j)),    # [bias+beta; alpha]
            ],
            out_specs=pl.BlockSpec((tm, tn), lambda i, j, k: (i, j)),
            scratch_shapes=[pltpu.VMEM((tm, tn), jnp.float32)],
        ),
        compiler_params=pltpu.CompilerParams(
            dimension_semantics=("parallel", "parallel", "arbitrary"),
            vmem_limit_bytes=vmem_limit,
        ),
        cost_estimate=cost,
    )(xp, wp, aux)

    if (Mp, Np) != (M, N):
        out_padded = out_padded[:M, :N]
    return out_padded


if __name__ == "__main__":
    key = jax.random.PRNGKey(0)
    k_x, k_w, k_b, k_a, k_x2, k_w2, k_b2, k_a2 = jax.random.split(key, 8)

    # --- Test 1: small module-like shape (batch=2, seq=8, hidden=32), f32 path. ---
    batch, seq = 2, 8
    in_features, out_features = 32, 32

    x = jax.random.normal(k_x, (batch, seq, in_features), dtype=jnp.float32)
    weight = jax.random.normal(k_w, (out_features, in_features), dtype=jnp.float32) * 0.1
    bias = jax.random.normal(k_b, (out_features,), dtype=jnp.float32) * 0.1
    beta = jnp.zeros((out_features,), dtype=jnp.float32)                 # torch.zeros
    alpha = jax.random.normal(k_a, (out_features,), dtype=jnp.float32)   # torch.randn

    x2d = x.reshape(batch * seq, in_features)
    y = bias_tuning_linear(x2d, weight, bias, beta, alpha).reshape(batch, seq, out_features)
    jax.block_until_ready(y)

    y_ref = alpha * (jnp.einsum("bsk,nk->bsn", x, weight,
                                precision=jax.lax.Precision.HIGHEST) + bias + beta)
    assert jnp.allclose(y, y_ref, atol=1e-4, rtol=1e-4), "f32 kernel mismatch vs reference"

    # --- Test 2: multi-k-step reduction (K > tk) with ragged (non-tile) M. ---
    M2, K2, N2 = 24, 1024, 384
    x2 = jax.random.normal(k_x2, (M2, K2), dtype=jnp.float32)
    w2 = jax.random.normal(k_w2, (N2, K2), dtype=jnp.float32) * 0.05
    b2 = jax.random.normal(k_b2, (N2,), dtype=jnp.float32) * 0.1
    be2 = jnp.zeros((N2,), dtype=jnp.float32)
    a2 = jax.random.normal(k_a2, (N2,), dtype=jnp.float32)

    y2 = bias_tuning_linear(x2, w2, b2, be2, a2)
    jax.block_until_ready(y2)
    y2_ref = a2 * (jnp.einsum("mk,nk->mn", x2, w2,
                              precision=jax.lax.Precision.HIGHEST) + b2 + be2)
    assert jnp.allclose(y2, y2_ref, atol=1e-3, rtol=1e-3), "multi-k kernel mismatch"

    # --- Test 3: bf16 MXU-operand path (f32 accumulation / epilogue / output). ---
    y3 = bias_tuning_linear(x2d, weight, bias, beta, alpha,
                            compute_dtype=jnp.bfloat16).reshape(batch, seq, out_features)
    jax.block_until_ready(y3)
    assert jnp.allclose(y3, y_ref, atol=5e-2, rtol=5e-2), "bf16 kernel mismatch"

    print("KERNEL_OK")
</pallas_src>

<mosaic_0001>
module attributes {stable_mosaic.version = 11 : i64} {
  func.func @bias_tuning_linear_kernel(%arg0: i32, %arg1: i32, %arg2: i32, %arg3: memref<16x128xf32, #tpu.memory_space<vmem>>, %arg4: memref<128x128xf32, #tpu.memory_space<vmem>>, %arg5: memref<2x128xf32, #tpu.memory_space<vmem>>, %arg6: memref<16x128xf32, #tpu.memory_space<vmem>>, %arg7: memref<16x128xf32, #tpu.memory_space<vmem>>) attributes {dimension_semantics = [#tpu.dimension_semantics<parallel>, #tpu.dimension_semantics<parallel>, #tpu.dimension_semantics<arbitrary>], iteration_bounds = array<i64: 1, 1, 1>, scalar_prefetch = 0 : i64, scratch_operands = 1 : i64, tpu.core_type = #tpu.core_type<tc>, window_params = [{transform_indices = @transform_0, window_bounds = array<i64: 16, 128>}, {transform_indices = @transform_1, window_bounds = array<i64: 128, 128>}, {transform_indices = @transform_2, window_bounds = array<i64: 2, 128>}, {transform_indices = @transform_3, window_bounds = array<i64: 16, 128>}]} {
    %c0_i32 = arith.constant 0 : i32
    %0 = arith.cmpi eq, %arg2, %c0_i32 : i32
    %1 = arith.extui %0 : i1 to i32
    %c0_i32_0 = arith.constant 0 : i32
    %2 = arith.cmpi ne, %1, %c0_i32_0 : i32
    scf.if %2 {
      %cst_10 = arith.constant 0.000000e+00 : f32
      %12 = vector.broadcast %cst_10 : f32 to vector<16x128xf32>
      %c0_11 = arith.constant 0 : index
      %c0_12 = arith.constant 0 : index
      %13 = vector.load %arg7[%c0_11, %c0_12] : memref<16x128xf32, #tpu.memory_space<vmem>>, vector<16x128xf32>
      tpu.vector_store %arg7[%c0_11, %c0_12], %12 {strides = array<i32>} : memref<16x128xf32, #tpu.memory_space<vmem>>, vector<16x128xf32>,
    } else {
    }
    %c0 = arith.constant 0 : index
    %c0_1 = arith.constant 0 : index
    %3 = vector.load %arg7[%c0, %c0_1] : memref<16x128xf32, #tpu.memory_space<vmem>>, vector<16x128xf32>
    %c0_2 = arith.constant 0 : index
    %c0_3 = arith.constant 0 : index
    %4 = vector.load %arg3[%c0_2, %c0_3] : memref<16x128xf32, #tpu.memory_space<vmem>>, vector<16x128xf32>
    %c0_4 = arith.constant 0 : index
    %c0_5 = arith.constant 0 : index
    %5 = vector.load %arg4[%c0_4, %c0_5] : memref<128x128xf32, #tpu.memory_space<vmem>>, vector<128x128xf32>
    %cst = arith.constant dense<0.000000e+00> : vector<16x128xf32>
    %6 = tpu.matmul %4, %5, %cst {dimension_numbers = #tpu.dot_dimension_numbers<[1], [0], [0], [1], [0, 0, 1, 1], [], []>} : vector<16x128xf32>, vector<128x128xf32>, vector<16x128xf32> -> vector<16x128xf32>
    %7 = arith.addf %3, %6 : vector<16x128xf32>
    %c0_6 = arith.constant 0 : index
    %c0_7 = arith.constant 0 : index
    %8 = vector.load %arg7[%c0_6, %c0_7] : memref<16x128xf32, #tpu.memory_space<vmem>>, vector<16x128xf32>
    tpu.vector_store %arg7[%c0_6, %c0_7], %7 {strides = array<i32>} : memref<16x128xf32, #tpu.memory_space<vmem>>, vector<16x128xf32>,
    %c0_i32_8 = arith.constant 0 : i32
    %9 = arith.cmpi eq, %arg2, %c0_i32_8 : i32
    %10 = arith.extui %9 : i1 to i32
    %c0_i32_9 = arith.constant 0 : i32
    %11 = arith.cmpi ne, %10, %c0_i32_9 : i32
    scf.if %11 {
      %c0_10 = arith.constant 0 : index
      %c0_11 = arith.constant 0 : index
      %12 = vector.load %arg5[%c0_10, %c0_11] : memref<2x128xf32, #tpu.memory_space<vmem>>, vector<1x128xf32>
      %c1 = arith.constant 1 : index
      %c0_12 = arith.constant 0 : index
      %13 = vector.load %arg5[%c1, %c0_12] : memref<2x128xf32, #tpu.memory_space<vmem>>, vector<1x128xf32>
      %c0_13 = arith.constant 0 : index
      %c0_14 = arith.constant 0 : index
      %14 = vector.load %arg7[%c0_13, %c0_14] : memref<16x128xf32, #tpu.memory_space<vmem>>, vector<16x128xf32>
      %15 = vector.broadcast %12 : vector<1x128xf32> to vector<16x128xf32>
      %16 = arith.addf %14, %15 : vector<16x128xf32>
      %17 = vector.broadcast %13 : vector<1x128xf32> to vector<16x128xf32>
      %18 = arith.mulf %17, %16 : vector<16x128xf32>
      %c0_15 = arith.constant 0 : index
      %c0_16 = arith.constant 0 : index
      %19 = vector.load %arg6[%c0_15, %c0_16] : memref<16x128xf32, #tpu.memory_space<vmem>>, vector<16x128xf32>
      tpu.vector_store %arg6[%c0_15, %c0_16], %18 {strides = array<i32>} : memref<16x128xf32, #tpu.memory_space<vmem>>, vector<16x128xf32>,
    } else {
    }
    return
  }
  func.func @transform_0(%arg0: i32, %arg1: i32, %arg2: i32) -> (i32, i32) {
    %c0_i32 = arith.constant 0 : i32
    return %arg0, %arg2 : i32, i32
  }
  func.func @transform_1(%arg0: i32, %arg1: i32, %arg2: i32) -> (i32, i32) {
    %c0_i32 = arith.constant 0 : i32
    return %arg2, %arg1 : i32, i32
  }
  func.func @transform_2(%arg0: i32, %arg1: i32, %arg2: i32) -> (i32, i32) {
    %c0_i32 = arith.constant 0 : i32
    %c0_i32_0 = arith.constant 0 : i32
    return %c0_i32, %arg1 : i32, i32
  }
  func.func @transform_3(%arg0: i32, %arg1: i32, %arg2: i32) -> (i32, i32) {
    %c0_i32 = arith.constant 0 : i32
    return %arg0, %arg1 : i32, i32
  }
}

</mosaic_0001>

<bundles_post_ra>
// kernel: tpu_custom_call.1
= control target key start
LH: loop header
LB: loop body
LE: loop exit
PB: predicated region body
PF: predicated region fallthrough
CT: control target
= control target key end

     0   :  { %8 = vsyncpa [#allocation4], 0  ;;  %s362_s0 = inlined_call_operand.hbm [shape: f32[16,128], index: 0, kind: input, shape index: {}]   ;;  %s363_s1 = inlined_call_operand.hbm [shape: f32[128,128], index: 1, kind: input, shape index: {}]   ;;  %s364_s2 = inlined_call_operand.vmem [shape: f32[2,128], index: 2, kind: input, shape index: {}]   ;;  %s365_s3 = inlined_call_operand.hbm [shape: f32[16,128], index: 3, kind: output, shape index: {}]  }
   0x1   :  { %9 = vsyncpa [#allocation7], 0 }
   0x2   :  { %10 = vsyncpa [#allocation5], 0  ;;  %s313_s12 = smov [#allocation3]  }
   0x3   :  { %s16_s13 = sshll.u32 %s313_s12, 4  ;;  %s17_s13 = int_to_ptr.vmem [resolvable:$true] %s16_s13 }
   0x4   :  { %s255_s14 = scalar_lea.vmem %s17_s13, 256  ;;  %p260_p1 = scmp.lt.s32.totalorder %s17_s13, %s17_s13 }
   0x5   :  { %p256_p0 = scmp.ne.s32.totalorder %s17_s13, %s255_s14  ;;  %p261_p2 = scmp.lt.s32.totalorder %s255_s14, %s255_s14 }
   0x7   :  { %p262_p3 = por %p261_p2, %p260_p1 }
   0x9   :  { %p263_p4 = pnand %p262_p3, %p256_p0 }
   0xb   :  { %266 = shalt.err (!%p263_p4)
}
   0xc   :  { %s314_s15 = smov 128   ;;  %s315_s16 = smov 8  }
   0xd   :  { %22 = dma.hbm_to_vmem [thread:$0]  %s362_s0, 256, %s17_s13, [#allocation4], %s314_s15, %s314_s15, %s315_s16  }
   0xe   :  { %s316_s19 = smov [#allocation6]  }
   0xf   :  { %s28_s20 = sshll.u32 %s316_s19, 4  ;;  %s29_s20 = int_to_ptr.vmem [resolvable:$true] %s28_s20 }
  0x10   :  { %s275_s21 = scalar_lea.vmem %s29_s20, 2048  ;;  %p280_p6 = scmp.lt.s32.totalorder %s29_s20, %s29_s20 }
  0x11   :  { %p276_p5 = scmp.ne.s32.totalorder %s29_s20, %s275_s21  ;;  %p281_p7 = scmp.lt.s32.totalorder %s275_s21, %s275_s21 }
  0x13   :  { %p282_p8 = por %p281_p7, %p280_p6 }
  0x15   :  { %p283_p9 = pnand %p282_p8, %p276_p5 }
  0x17   :  { %286 = shalt.err (!%p283_p9)
}
  0x18   :  { %34 = dma.hbm_to_vmem [thread:$0]  %s363_s1, 2048, %s29_s20, [#allocation7], %s314_s15, %s314_s15, %s315_s16  }
  0x19   :  { %307 = dma.done.wait [#allocation4], 256  }
  0x1a   :  { %308 = vsyncadd [#allocation4], 4294967040 }
  0x1b   :  { %309 = dma.done.wait [#allocation7], 2048  }
  0x1c   :  { %310 = vsyncadd [#allocation7], 4294965248  ;;  %v68_v0 = vld [vmem:[#allocation6 + $0x78] sm:$0xff]  ;;  %v67_v1 = vld [vmem:[#allocation6 + $0x70] sm:$0xff]  ;;  %s317_s26 = smov [#allocation8]  }
  0x1d   :  { %207 = vmatprep.subr.mxu0 %v68_v0  ;;  %v66_v2 = vld [vmem:[#allocation6 + $0x68] sm:$0xff]  ;;  %v65_v3 = vld [vmem:[#allocation6 + $0x60] sm:$0xff]  ;;  %v51_v4 = vld [vmem:[#allocation3] sm:$0xff]  ;;  %s174_s27 = sshll.u32 %s317_s26, 4  ;;  %s175_s27 = int_to_ptr.vmem [resolvable:$true] %s174_s27 }
  0x1e   :  { %208 = vmatpush3.msra.mxu0 %v68_v0  ;;  %v64_v5 = vld [vmem:[#allocation6 + $0x58] sm:$0xff]  ;;  %239 = vmatprep.mubr.f32.mxu0 %v51_v4  ;;  %v63_v6 = vld [vmem:[#allocation6 + $0x50] sm:$0xff]  ;;  %v62_v7 = vld [vmem:[#allocation6 + $0x48] sm:$0xff]  ;;  %s287_s28 = scalar_lea.vmem %s175_s27, 256  ;;  %p292_p11 = scmp.lt.s32.totalorder %s175_s27, %s175_s27 }
  0x1f   :  { %209 = vmatprep.subr.mxu0 %v67_v1  ;;  %v61_v8 = vld [vmem:[#allocation6 + $0x40] sm:$0xff]  ;;  %v60_v9 = vld [vmem:[#allocation6 + $0x38] sm:$0xff]  ;;  %v59_v10 = vld [vmem:[#allocation6 + $0x30] sm:$0xff]  ;;  %p288_p10 = scmp.ne.s32.totalorder %s175_s27, %s287_s28  ;;  %p293_p12 = scmp.lt.s32.totalorder %s287_s28, %s287_s28 }
  0x20   :  { %210 = vmatpush3.msra.mxu0 %v67_v1  ;;  %v58_v11 = vld [vmem:[#allocation6 + $0x28] sm:$0xff]  ;;  %v57_v12 = vld [vmem:[#allocation6 + $0x20] sm:$0xff]  ;;  %v56_v13 = vld [vmem:[#allocation6 + $0x18] sm:$0xff] }
  0x21   :  { %211 = vmatprep.subr.mxu0 %v66_v2  ;;  %v55_v14 = vld [vmem:[#allocation6 + $0x10] sm:$0xff]  ;;  %v54_v15 = vld [vmem:[#allocation6 + $0x8] sm:$0xff]  ;;  %v53_v16 = vld [vmem:[#allocation6] sm:$0xff]  ;;  %p294_p13 = por %p293_p12, %p292_p11 }
  0x22   :  { %212 = vmatpush3.msra.mxu0 %v66_v2  ;;  %v52_v17 = vld [vmem:[#allocation3 + $0x8] sm:$0xff]  ;;  %v187_v18 = vld [vmem:[%s364_s2] ss:$0 sm:$0xff]  ;;  %v188_v20 = vld [vmem:[%s364_s2 + $0x1] ss:$0 sm:$0xff] }
  0x23   :  { %213 = vmatprep.subr.mxu0 %v65_v3  ;;  %p295_p0 = pnand %p294_p13, %p288_p10 }
  0x24   :  { %214 = vmatpush3.msra.mxu0 %v65_v3 }
  0x25   :  { %215 = vmatprep.subr.mxu0 %v64_v5 }
  0x26   :  { %216 = vmatpush3.msra.mxu0 %v64_v5 }
  0x27   :  { %217 = vmatprep.subr.mxu0 %v63_v6 }
  0x28   :  { %218 = vmatpush3.msra.mxu0 %v63_v6 }
  0x29   :  { %219 = vmatprep.subr.mxu0 %v62_v7 }
  0x2a   :  { %220 = vmatpush3.msra.mxu0 %v62_v7 }
  0x2b   :  { %221 = vmatprep.subr.mxu0 %v61_v8 }
  0x2c   :  { %222 = vmatpush3.msra.mxu0 %v61_v8 }
  0x2d   :  { %223 = vmatprep.subr.mxu0 %v60_v9 }
  0x2e   :  { %224 = vmatpush3.msra.mxu0 %v60_v9 }
  0x2f   :  { %225 = vmatprep.subr.mxu0 %v59_v10 }
  0x30   :  { %226 = vmatpush3.msra.mxu0 %v59_v10 }
  0x31   :  { %227 = vmatprep.subr.mxu0 %v58_v11 }
  0x32   :  { %228 = vmatpush3.msra.mxu0 %v58_v11 }
  0x33   :  { %229 = vmatprep.subr.mxu0 %v57_v12 }
  0x34   :  { %230 = vmatpush3.msra.mxu0 %v57_v12 }
  0x35   :  { %231 = vmatprep.subr.mxu0 %v56_v13 }
  0x36   :  { %232 = vmatpush3.msra.mxu0 %v56_v13 }
  0x37   :  { %233 = vmatprep.subr.mxu0 %v55_v14 }
  0x38   :  { %234 = vmatpush3.msra.mxu0 %v55_v14 }
  0x39   :  { %235 = vmatprep.subr.mxu0 %v54_v15 }
  0x3a   :  { %236 = vmatpush3.msra.mxu0 %v54_v15 }
  0x3b   :  { %237 = vmatprep.subr.mxu0 %v53_v16 }
  0x3c   :  { %238 = vmatpush3.msra.mxu0 %v53_v16 }
  0x3d   :  { %240 = vmatmul.mubr.f32.vlgmr.msra.gmra.mxu0 %v52_v17 }
  0xfd   :  { %v241_v19 = vpop.f32.mrf.mxu0 }
  0xfe   :  { %v160_v21 = vadd.f32 %v241_v19, %v187_v18 }
  0xff   :  { %v135_v22 = vpop.f32.mrf.mxu0 }
 0x100   :  { %v166_v23 = vmul.f32 %v188_v20, %v160_v21  ;;  %v159_v24 = vadd.f32 %v187_v18, %v135_v22 }
 0x102   :  { %168 = vst [vmem:[#allocation8 + $0x8] sm:$0xff] %v166_v23  ;;  %v165_v25 = vmul.f32 %v188_v20, %v159_v24 }
 0x104   :  { %167 = vst [vmem:[#allocation8] sm:$0xff] %v165_v25 }
 0x105   :  { %298 = shalt.err (!%p295_p0)
}
 0x106   :  { %180 = dma.vmem_to_hbm [thread:$0]  %s175_s27, 256, %s365_s3, [#allocation5], %s314_s15, %s314_s15, %s315_s16  }
 0x107   :  { %311 = dma.done.wait [#allocation5], 256  }
 0x108   :  { %312 = vsyncadd [#allocation5], 4294967040 }
 0x109   :  { %184 = vsyncpa [#allocation4], 1 }
 0x10a   :  { %185 = vsyncpa [#allocation7], 1 }
 0x10b   :  { %186 = vsyncpa [#allocation5], 1 }

</bundles_post_ra>
